<compile_context>
chip_gen: v7x
topology: tpu7x:2x2x1
jax: 0.10.0
libtpu: 0.0.40
codegen_flags: <defaults>
</compile_context>

<pallas_src>
import jax
import jax.numpy as jnp
from jax.experimental import pallas as pl
from jax.experimental.pallas import tpu as pltpu


def _lstm_kernel(x_ref, wih_ref, whh_ref, b_ref, wlin_ref, blin_ref, out_ref):
    seq_len = x_ref.shape[0]
    H = whh_ref.shape[0]

    # Hoisted input projection with fused bias: (seq_len, 4H), one MXU pass
    # amortized over every time step.
    x_proj = (jnp.dot(x_ref[...].astype(jnp.float32), wih_ref[...],
                      preferred_element_type=jnp.float32)
              + b_ref[...])
    w_hh = whh_ref[...]

    h = jnp.zeros((1, H), jnp.float32)
    c = jnp.zeros((1, H), jnp.float32)

    # seq_len is small and static -> fully unrolled recurrence; only one
    # (1,H)@(H,4H) matmul sits on the serial dependence chain per step.
    for t in range(seq_len):
        pre = x_proj[t:t + 1, :] + jnp.dot(h, w_hh,
                                           preferred_element_type=jnp.float32)
        sig = jax.nn.sigmoid(pre)   # one EUP pass over all 4H lanes
        tnh = jnp.tanh(pre)         # one EUP pass over all 4H lanes
        i_g = sig[:, 0:H]
        f_g = sig[:, H:2 * H]
        g_g = tnh[:, 2 * H:3 * H]
        o_g = sig[:, 3 * H:4 * H]
        c = f_g * c + i_g * g_g
        h = o_g * jnp.tanh(c)

    # Fused linear head on the final hidden state.
    out_ref[...] = (jnp.dot(h, wlin_ref[...], preferred_element_type=jnp.float32)
                    + blin_ref[...]).astype(out_ref.dtype)


def lstm_forward(input_seq, params):
    """input_seq: (seq_len,) float32. Returns (output_size,) == predictions[-1]."""
    w_ih, w_hh, b, w_lin, b_lin = params
    seq_len = input_seq.shape[0]
    input_size = w_ih.shape[0]
    hidden = w_hh.shape[0]
    out_size = w_lin.shape[1]

    x = input_seq.reshape(seq_len, input_size).astype(jnp.float32)

    out = pl.pallas_call(
        _lstm_kernel,
        out_shape=jax.ShapeDtypeStruct((1, out_size), jnp.float32),
        grid_spec=pltpu.PrefetchScalarGridSpec(
            num_scalar_prefetch=0,
            grid=(1,),  # single invocation; time loop lives inside the kernel
            in_specs=[
                pl.BlockSpec((seq_len, input_size), lambda i: (0, 0)),     # x
                pl.BlockSpec((input_size, 4 * hidden), lambda i: (0, 0)),  # w_ih packed
                pl.BlockSpec((hidden, 4 * hidden), lambda i: (0, 0)),      # w_hh packed
                pl.BlockSpec((1, 4 * hidden), lambda i: (0, 0)),           # b packed
                pl.BlockSpec((hidden, out_size), lambda i: (0, 0)),        # w_lin
                pl.BlockSpec((1, out_size), lambda i: (0, 0)),             # b_lin
            ],
            out_specs=pl.BlockSpec((1, out_size), lambda i: (0, 0)),
        ),
        compiler_params=pltpu.CompilerParams(
            dimension_semantics=("arbitrary",)),
    )(x, w_ih, w_hh, b, w_lin, b_lin)
    return out[0]


def init_params(key, input_size=1, hidden=32, out_size=2):
    """Deterministic synthetic params; packed gate layout (columns i,f,g,o),
    equivalent to torch's weight_ih_l0/weight_hh_l0 transposed + stacked."""
    k = jax.random.split(key, 6)
    bound = 1.0 / jnp.sqrt(hidden)
    w_ih = jax.random.uniform(k[0], (input_size, 4 * hidden), jnp.float32, -bound, bound)
    w_hh = jax.random.uniform(k[1], (hidden, 4 * hidden), jnp.float32, -bound, bound)
    b_ih = jax.random.uniform(k[2], (1, 4 * hidden), jnp.float32, -bound, bound)
    b_hh = jax.random.uniform(k[3], (1, 4 * hidden), jnp.float32, -bound, bound)
    b = b_ih + b_hh
    w_lin = jax.random.uniform(k[4], (hidden, out_size), jnp.float32, -bound, bound)
    b_lin = jax.random.uniform(k[5], (1, out_size), jnp.float32, -bound, bound)
    return w_ih, w_hh, b, w_lin, b_lin


def lstm_reference(input_seq, params):
    """Pure-JAX reference of the PyTorch forward (for correctness check)."""
    w_ih, w_hh, b, w_lin, b_lin = params
    H = w_hh.shape[0]
    x = input_seq.reshape(-1, w_ih.shape[0]).astype(jnp.float32)

    def step(carry, x_t):
        h, c = carry
        pre = x_t[None, :] @ w_ih + h @ w_hh + b
        i = jax.nn.sigmoid(pre[:, 0:H])
        f = jax.nn.sigmoid(pre[:, H:2 * H])
        g = jnp.tanh(pre[:, 2 * H:3 * H])
        o = jax.nn.sigmoid(pre[:, 3 * H:4 * H])
        c_new = f * c + i * g
        h_new = o * jnp.tanh(c_new)
        return (h_new, c_new), None

    h0 = jnp.zeros((1, H), jnp.float32)
    c0 = jnp.zeros((1, H), jnp.float32)
    (h_last, _), _ = jax.lax.scan(step, (h0, c0), x)
    return (h_last @ w_lin + b_lin)[0]


if __name__ == "__main__":
    key = jax.random.PRNGKey(0)
    kp, kx = jax.random.split(key)

    seq_len, input_size, hidden, out_size = 8, 1, 32, 2
    params = init_params(kp, input_size, hidden, out_size)
    input_seq = jax.random.normal(kx, (seq_len,), jnp.float32)

    # TODO(synk): the torch module carries self.hidden_cell across forward()
    # calls; this kernel starts from the zero state each call (matches the
    # module's initial state / first forward).
    pred = jax.block_until_ready(lstm_forward(input_seq, params))
    ref = jax.block_until_ready(lstm_reference(input_seq, params))

    assert pred.shape == (out_size,)
    assert jnp.allclose(pred, ref, atol=1e-5, rtol=1e-5), (pred, ref)
    print("KERNEL_OK")
</pallas_src>

<mosaic_0001>
module attributes {stable_mosaic.version = 11 : i64} {
  func.func @_lstm_kernel(%arg0: i32, %arg1: memref<8x1xf32, #tpu.memory_space<vmem>>, %arg2: memref<1x128xf32, #tpu.memory_space<vmem>>, %arg3: memref<32x128xf32, #tpu.memory_space<vmem>>, %arg4: memref<1x128xf32, #tpu.memory_space<vmem>>, %arg5: memref<32x2xf32, #tpu.memory_space<vmem>>, %arg6: memref<1x2xf32, #tpu.memory_space<vmem>>, %arg7: memref<1x2xf32, #tpu.memory_space<vmem>>) attributes {dimension_semantics = [#tpu.dimension_semantics<arbitrary>], iteration_bounds = array<i64: 1>, scalar_prefetch = 0 : i64, scratch_operands = 0 : i64, tpu.core_type = #tpu.core_type<tc>, window_params = [{pipeline_mode = #tpu.pipeline_mode<synchronous>, transform_indices = @transform_0, window_bounds = array<i64: 8, 1>}, {pipeline_mode = #tpu.pipeline_mode<synchronous>, transform_indices = @transform_1, window_bounds = array<i64: 1, 128>}, {pipeline_mode = #tpu.pipeline_mode<synchronous>, transform_indices = @transform_2, window_bounds = array<i64: 32, 128>}, {pipeline_mode = #tpu.pipeline_mode<synchronous>, transform_indices = @transform_3, window_bounds = array<i64: 1, 128>}, {pipeline_mode = #tpu.pipeline_mode<synchronous>, transform_indices = @transform_4, window_bounds = array<i64: 32, 2>}, {pipeline_mode = #tpu.pipeline_mode<synchronous>, transform_indices = @transform_5, window_bounds = array<i64: 1, 2>}, {pipeline_mode = #tpu.pipeline_mode<synchronous>, transform_indices = @transform_6, window_bounds = array<i64: 1, 2>}]} {
    %c0 = arith.constant 0 : index
    %c0_0 = arith.constant 0 : index
    %0 = vector.load %arg1[%c0, %c0_0] : memref<8x1xf32, #tpu.memory_space<vmem>>, vector<8x1xf32>
    %c0_1 = arith.constant 0 : index
    %c0_2 = arith.constant 0 : index
    %1 = vector.load %arg2[%c0_1, %c0_2] : memref<1x128xf32, #tpu.memory_space<vmem>>, vector<1x128xf32>
    %cst = arith.constant dense<0.000000e+00> : vector<8x128xf32>
    %2 = tpu.matmul %0, %1, %cst {dimension_numbers = #tpu.dot_dimension_numbers<[1], [0], [0], [1], [0, 0, 1, 1], [], []>} : vector<8x1xf32>, vector<1x128xf32>, vector<8x128xf32> -> vector<8x128xf32>
    %c0_3 = arith.constant 0 : index
    %c0_4 = arith.constant 0 : index
    %3 = vector.load %arg4[%c0_3, %c0_4] : memref<1x128xf32, #tpu.memory_space<vmem>>, vector<1x128xf32>
    %4 = vector.broadcast %3 : vector<1x128xf32> to vector<8x128xf32>
    %5 = arith.addf %2, %4 : vector<8x128xf32>
    %c0_5 = arith.constant 0 : index
    %c0_6 = arith.constant 0 : index
    %6 = vector.load %arg3[%c0_5, %c0_6] : memref<32x128xf32, #tpu.memory_space<vmem>>, vector<32x128xf32>
    %cst_7 = arith.constant 0.000000e+00 : f32
    %7 = vector.broadcast %cst_7 : f32 to vector<1x32xf32>
    %cst_8 = arith.constant 0.000000e+00 : f32
    %8 = vector.broadcast %cst_8 : f32 to vector<1x32xf32>
    %9 = vector.extract_strided_slice %5 {offsets = [0, 0], sizes = [1, 128], strides = [1, 1]} : vector<8x128xf32> to vector<1x128xf32>
    %cst_9 = arith.constant dense<0.000000e+00> : vector<1x128xf32>
    %10 = tpu.matmul %7, %6, %cst_9 {dimension_numbers = #tpu.dot_dimension_numbers<[1], [0], [0], [1], [0, 0, 1, 1], [], []>} : vector<1x32xf32>, vector<32x128xf32>, vector<1x128xf32> -> vector<1x128xf32>
    %11 = arith.addf %9, %10 : vector<1x128xf32>
    %12 = arith.negf %11 : vector<1x128xf32>
    %13 = math.exp %12 : vector<1x128xf32>
    %cst_10 = arith.constant 1.000000e+00 : f32
    %14 = vector.broadcast %cst_10 : f32 to vector<1x128xf32>
    %15 = arith.addf %14, %13 : vector<1x128xf32>
    %16 = arith.divf %14, %15 : vector<1x128xf32>
    %17 = math.tanh %11 : vector<1x128xf32>
    %18 = vector.extract_strided_slice %16 {offsets = [0, 0], sizes = [1, 32], strides = [1, 1]} : vector<1x128xf32> to vector<1x32xf32>
    %19 = vector.extract_strided_slice %16 {offsets = [0, 32], sizes = [1, 32], strides = [1, 1]} : vector<1x128xf32> to vector<1x32xf32>
    %20 = vector.extract_strided_slice %17 {offsets = [0, 64], sizes = [1, 32], strides = [1, 1]} : vector<1x128xf32> to vector<1x32xf32>
    %21 = vector.extract_strided_slice %16 {offsets = [0, 96], sizes = [1, 32], strides = [1, 1]} : vector<1x128xf32> to vector<1x32xf32>
    %22 = arith.mulf %19, %8 : vector<1x32xf32>
    %23 = arith.mulf %18, %20 : vector<1x32xf32>
    %24 = arith.addf %22, %23 : vector<1x32xf32>
    %25 = math.tanh %24 : vector<1x32xf32>
    %26 = arith.mulf %21, %25 : vector<1x32xf32>
    %27 = vector.extract_strided_slice %5 {offsets = [1, 0], sizes = [1, 128], strides = [1, 1]} : vector<8x128xf32> to vector<1x128xf32>
    %cst_11 = arith.constant dense<0.000000e+00> : vector<1x128xf32>
    %28 = tpu.matmul %26, %6, %cst_11 {dimension_numbers = #tpu.dot_dimension_numbers<[1], [0], [0], [1], [0, 0, 1, 1], [], []>} : vector<1x32xf32>, vector<32x128xf32>, vector<1x128xf32> -> vector<1x128xf32>
    %29 = arith.addf %27, %28 : vector<1x128xf32>
    %30 = arith.negf %29 : vector<1x128xf32>
    %31 = math.exp %30 : vector<1x128xf32>
    %cst_12 = arith.constant 1.000000e+00 : f32
    %32 = vector.broadcast %cst_12 : f32 to vector<1x128xf32>
    %33 = arith.addf %32, %31 : vector<1x128xf32>
    %34 = arith.divf %32, %33 : vector<1x128xf32>
    %35 = math.tanh %29 : vector<1x128xf32>
    %36 = vector.extract_strided_slice %34 {offsets = [0, 0], sizes = [1, 32], strides = [1, 1]} : vector<1x128xf32> to vector<1x32xf32>
    %37 = vector.extract_strided_slice %34 {offsets = [0, 32], sizes = [1, 32], strides = [1, 1]} : vector<1x128xf32> to vector<1x32xf32>
    %38 = vector.extract_strided_slice %35 {offsets = [0, 64], sizes = [1, 32], strides = [1, 1]} : vector<1x128xf32> to vector<1x32xf32>
    %39 = vector.extract_strided_slice %34 {offsets = [0, 96], sizes = [1, 32], strides = [1, 1]} : vector<1x128xf32> to vector<1x32xf32>
    %40 = arith.mulf %37, %24 : vector<1x32xf32>
    %41 = arith.mulf %36, %38 : vector<1x32xf32>
    %42 = arith.addf %40, %41 : vector<1x32xf32>
    %43 = math.tanh %42 : vector<1x32xf32>
    %44 = arith.mulf %39, %43 : vector<1x32xf32>
    %45 = vector.extract_strided_slice %5 {offsets = [2, 0], sizes = [1, 128], strides = [1, 1]} : vector<8x128xf32> to vector<1x128xf32>
    %cst_13 = arith.constant dense<0.000000e+00> : vector<1x128xf32>
    %46 = tpu.matmul %44, %6, %cst_13 {dimension_numbers = #tpu.dot_dimension_numbers<[1], [0], [0], [1], [0, 0, 1, 1], [], []>} : vector<1x32xf32>, vector<32x128xf32>, vector<1x128xf32> -> vector<1x128xf32>
    %47 = arith.addf %45, %46 : vector<1x128xf32>
    %48 = arith.negf %47 : vector<1x128xf32>
    %49 = math.exp %48 : vector<1x128xf32>
    %cst_14 = arith.constant 1.000000e+00 : f32
    %50 = vector.broadcast %cst_14 : f32 to vector<1x128xf32>
    %51 = arith.addf %50, %49 : vector<1x128xf32>
    %52 = arith.divf %50, %51 : vector<1x128xf32>
    %53 = math.tanh %47 : vector<1x128xf32>
    %54 = vector.extract_strided_slice %52 {offsets = [0, 0], sizes = [1, 32], strides = [1, 1]} : vector<1x128xf32> to vector<1x32xf32>
    %55 = vector.extract_strided_slice %52 {offsets = [0, 32], sizes = [1, 32], strides = [1, 1]} : vector<1x128xf32> to vector<1x32xf32>
    %56 = vector.extract_strided_slice %53 {offsets = [0, 64], sizes = [1, 32], strides = [1, 1]} : vector<1x128xf32> to vector<1x32xf32>
    %57 = vector.extract_strided_slice %52 {offsets = [0, 96], sizes = [1, 32], strides = [1, 1]} : vector<1x128xf32> to vector<1x32xf32>
    %58 = arith.mulf %55, %42 : vector<1x32xf32>
    %59 = arith.mulf %54, %56 : vector<1x32xf32>
    %60 = arith.addf %58, %59 : vector<1x32xf32>
    %61 = math.tanh %60 : vector<1x32xf32>
    %62 = arith.mulf %57, %61 : vector<1x32xf32>
    %63 = vector.extract_strided_slice %5 {offsets = [3, 0], sizes = [1, 128], strides = [1, 1]} : vector<8x128xf32> to vector<1x128xf32>
    %cst_15 = arith.constant dense<0.000000e+00> : vector<1x128xf32>
    %64 = tpu.matmul %62, %6, %cst_15 {dimension_numbers = #tpu.dot_dimension_numbers<[1], [0], [0], [1], [0, 0, 1, 1], [], []>} : vector<1x32xf32>, vector<32x128xf32>, vector<1x128xf32> -> vector<1x128xf32>
    %65 = arith.addf %63, %64 : vector<1x128xf32>
    %66 = arith.negf %65 : vector<1x128xf32>
    %67 = math.exp %66 : vector<1x128xf32>
    %cst_16 = arith.constant 1.000000e+00 : f32
    %68 = vector.broadcast %cst_16 : f32 to vector<1x128xf32>
    %69 = arith.addf %68, %67 : vector<1x128xf32>
    %70 = arith.divf %68, %69 : vector<1x128xf32>
    %71 = math.tanh %65 : vector<1x128xf32>
    %72 = vector.extract_strided_slice %70 {offsets = [0, 0], sizes = [1, 32], strides = [1, 1]} : vector<1x128xf32> to vector<1x32xf32>
    %73 = vector.extract_strided_slice %70 {offsets = [0, 32], sizes = [1, 32], strides = [1, 1]} : vector<1x128xf32> to vector<1x32xf32>
    %74 = vector.extract_strided_slice %71 {offsets = [0, 64], sizes = [1, 32], strides = [1, 1]} : vector<1x128xf32> to vector<1x32xf32>
    %75 = vector.extract_strided_slice %70 {offsets = [0, 96], sizes = [1, 32], strides = [1, 1]} : vector<1x128xf32> to vector<1x32xf32>
    %76 = arith.mulf %73, %60 : vector<1x32xf32>
    %77 = arith.mulf %72, %74 : vector<1x32xf32>
    %78 = arith.addf %76, %77 : vector<1x32xf32>
    %79 = math.tanh %78 : vector<1x32xf32>
    %80 = arith.mulf %75, %79 : vector<1x32xf32>
    %81 = vector.extract_strided_slice %5 {offsets = [4, 0], sizes = [1, 128], strides = [1, 1]} : vector<8x128xf32> to vector<1x128xf32>
    %cst_17 = arith.constant dense<0.000000e+00> : vector<1x128xf32>
    %82 = tpu.matmul %80, %6, %cst_17 {dimension_numbers = #tpu.dot_dimension_numbers<[1], [0], [0], [1], [0, 0, 1, 1], [], []>} : vector<1x32xf32>, vector<32x128xf32>, vector<1x128xf32> -> vector<1x128xf32>
    %83 = arith.addf %81, %82 : vector<1x128xf32>
    %84 = arith.negf %83 : vector<1x128xf32>
    %85 = math.exp %84 : vector<1x128xf32>
    %cst_18 = arith.constant 1.000000e+00 : f32
    %86 = vector.broadcast %cst_18 : f32 to vector<1x128xf32>
    %87 = arith.addf %86, %85 : vector<1x128xf32>
    %88 = arith.divf %86, %87 : vector<1x128xf32>
    %89 = math.tanh %83 : vector<1x128xf32>
    %90 = vector.extract_strided_slice %88 {offsets = [0, 0], sizes = [1, 32], strides = [1, 1]} : vector<1x128xf32> to vector<1x32xf32>
    %91 = vector.extract_strided_slice %88 {offsets = [0, 32], sizes = [1, 32], strides = [1, 1]} : vector<1x128xf32> to vector<1x32xf32>
    %92 = vector.extract_strided_slice %89 {offsets = [0, 64], sizes = [1, 32], strides = [1, 1]} : vector<1x128xf32> to vector<1x32xf32>
    %93 = vector.extract_strided_slice %88 {offsets = [0, 96], sizes = [1, 32], strides = [1, 1]} : vector<1x128xf32> to vector<1x32xf32>
    %94 = arith.mulf %91, %78 : vector<1x32xf32>
    %95 = arith.mulf %90, %92 : vector<1x32xf32>
    %96 = arith.addf %94, %95 : vector<1x32xf32>
    %97 = math.tanh %96 : vector<1x32xf32>
    %98 = arith.mulf %93, %97 : vector<1x32xf32>
    %99 = vector.extract_strided_slice %5 {offsets = [5, 0], sizes = [1, 128], strides = [1, 1]} : vector<8x128xf32> to vector<1x128xf32>
    %cst_19 = arith.constant dense<0.000000e+00> : vector<1x128xf32>
    %100 = tpu.matmul %98, %6, %cst_19 {dimension_numbers = #tpu.dot_dimension_numbers<[1], [0], [0], [1], [0, 0, 1, 1], [], []>} : vector<1x32xf32>, vector<32x128xf32>, vector<1x128xf32> -> vector<1x128xf32>
    %101 = arith.addf %99, %100 : vector<1x128xf32>
    %102 = arith.negf %101 : vector<1x128xf32>
    %103 = math.exp %102 : vector<1x128xf32>
    %cst_20 = arith.constant 1.000000e+00 : f32
    %104 = vector.broadcast %cst_20 : f32 to vector<1x128xf32>
    %105 = arith.addf %104, %103 : vector<1x128xf32>
    %106 = arith.divf %104, %105 : vector<1x128xf32>
    %107 = math.tanh %101 : vector<1x128xf32>
    %108 = vector.extract_strided_slice %106 {offsets = [0, 0], sizes = [1, 32], strides = [1, 1]} : vector<1x128xf32> to vector<1x32xf32>
    %109 = vector.extract_strided_slice %106 {offsets = [0, 32], sizes = [1, 32], strides = [1, 1]} : vector<1x128xf32> to vector<1x32xf32>
    %110 = vector.extract_strided_slice %107 {offsets = [0, 64], sizes = [1, 32], strides = [1, 1]} : vector<1x128xf32> to vector<1x32xf32>
    %111 = vector.extract_strided_slice %106 {offsets = [0, 96], sizes = [1, 32], strides = [1, 1]} : vector<1x128xf32> to vector<1x32xf32>
    %112 = arith.mulf %109, %96 : vector<1x32xf32>
    %113 = arith.mulf %108, %110 : vector<1x32xf32>
    %114 = arith.addf %112, %113 : vector<1x32xf32>
    %115 = math.tanh %114 : vector<1x32xf32>
    %116 = arith.mulf %111, %115 : vector<1x32xf32>
    %117 = vector.extract_strided_slice %5 {offsets = [6, 0], sizes = [1, 128], strides = [1, 1]} : vector<8x128xf32> to vector<1x128xf32>
    %cst_21 = arith.constant dense<0.000000e+00> : vector<1x128xf32>
    %118 = tpu.matmul %116, %6, %cst_21 {dimension_numbers = #tpu.dot_dimension_numbers<[1], [0], [0], [1], [0, 0, 1, 1], [], []>} : vector<1x32xf32>, vector<32x128xf32>, vector<1x128xf32> -> vector<1x128xf32>
    %119 = arith.addf %117, %118 : vector<1x128xf32>
    %120 = arith.negf %119 : vector<1x128xf32>
    %121 = math.exp %120 : vector<1x128xf32>
    %cst_22 = arith.constant 1.000000e+00 : f32
    %122 = vector.broadcast %cst_22 : f32 to vector<1x128xf32>
    %123 = arith.addf %122, %121 : vector<1x128xf32>
    %124 = arith.divf %122, %123 : vector<1x128xf32>
    %125 = math.tanh %119 : vector<1x128xf32>
    %126 = vector.extract_strided_slice %124 {offsets = [0, 0], sizes = [1, 32], strides = [1, 1]} : vector<1x128xf32> to vector<1x32xf32>
    %127 = vector.extract_strided_slice %124 {offsets = [0, 32], sizes = [1, 32], strides = [1, 1]} : vector<1x128xf32> to vector<1x32xf32>
    %128 = vector.extract_strided_slice %125 {offsets = [0, 64], sizes = [1, 32], strides = [1, 1]} : vector<1x128xf32> to vector<1x32xf32>
    %129 = vector.extract_strided_slice %124 {offsets = [0, 96], sizes = [1, 32], strides = [1, 1]} : vector<1x128xf32> to vector<1x32xf32>
    %130 = arith.mulf %127, %114 : vector<1x32xf32>
    %131 = arith.mulf %126, %128 : vector<1x32xf32>
    %132 = arith.addf %130, %131 : vector<1x32xf32>
    %133 = math.tanh %132 : vector<1x32xf32>
    %134 = arith.mulf %129, %133 : vector<1x32xf32>
    %135 = vector.extract_strided_slice %5 {offsets = [7, 0], sizes = [1, 128], strides = [1, 1]} : vector<8x128xf32> to vector<1x128xf32>
    %cst_23 = arith.constant dense<0.000000e+00> : vector<1x128xf32>
    %136 = tpu.matmul %134, %6, %cst_23 {dimension_numbers = #tpu.dot_dimension_numbers<[1], [0], [0], [1], [0, 0, 1, 1], [], []>} : vector<1x32xf32>, vector<32x128xf32>, vector<1x128xf32> -> vector<1x128xf32>
    %137 = arith.addf %135, %136 : vector<1x128xf32>
    %138 = arith.negf %137 : vector<1x128xf32>
    %139 = math.exp %138 : vector<1x128xf32>
    %cst_24 = arith.constant 1.000000e+00 : f32
    %140 = vector.broadcast %cst_24 : f32 to vector<1x128xf32>
    %141 = arith.addf %140, %139 : vector<1x128xf32>
    %142 = arith.divf %140, %141 : vector<1x128xf32>
    %143 = math.tanh %137 : vector<1x128xf32>
    %144 = vector.extract_strided_slice %142 {offsets = [0, 0], sizes = [1, 32], strides = [1, 1]} : vector<1x128xf32> to vector<1x32xf32>
    %145 = vector.extract_strided_slice %142 {offsets = [0, 32], sizes = [1, 32], strides = [1, 1]} : vector<1x128xf32> to vector<1x32xf32>
    %146 = vector.extract_strided_slice %143 {offsets = [0, 64], sizes = [1, 32], strides = [1, 1]} : vector<1x128xf32> to vector<1x32xf32>
    %147 = vector.extract_strided_slice %142 {offsets = [0, 96], sizes = [1, 32], strides = [1, 1]} : vector<1x128xf32> to vector<1x32xf32>
    %148 = arith.mulf %145, %132 : vector<1x32xf32>
    %149 = arith.mulf %144, %146 : vector<1x32xf32>
    %150 = arith.addf %148, %149 : vector<1x32xf32>
    %151 = math.tanh %150 : vector<1x32xf32>
    %152 = arith.mulf %147, %151 : vector<1x32xf32>
    %c0_25 = arith.constant 0 : index
    %c0_26 = arith.constant 0 : index
    %153 = vector.load %arg5[%c0_25, %c0_26] : memref<32x2xf32, #tpu.memory_space<vmem>>, vector<32x2xf32>
    %cst_27 = arith.constant dense<0.000000e+00> : vector<1x2xf32>
    %154 = tpu.matmul %152, %153, %cst_27 {dimension_numbers = #tpu.dot_dimension_numbers<[1], [0], [0], [1], [0, 0, 1, 1], [], []>} : vector<1x32xf32>, vector<32x2xf32>, vector<1x2xf32> -> vector<1x2xf32>
    %c0_28 = arith.constant 0 : index
    %c0_29 = arith.constant 0 : index
    %155 = vector.load %arg6[%c0_28, %c0_29] : memref<1x2xf32, #tpu.memory_space<vmem>>, vector<1x2xf32>
    %156 = arith.addf %154, %155 : vector<1x2xf32>
    %c0_30 = arith.constant 0 : index
    %c0_31 = arith.constant 0 : index
    %157 = vector.load %arg7[%c0_30, %c0_31] : memref<1x2xf32, #tpu.memory_space<vmem>>, vector<1x2xf32>
    tpu.vector_store %arg7[%c0_30, %c0_31], %156 {strides = array<i32>} : memref<1x2xf32, #tpu.memory_space<vmem>>, vector<1x2xf32>,
    return
  }
  func.func @transform_0(%arg0: i32) -> (i32, i32) {
    %c0_i32 = arith.constant 0 : i32
    %c0_i32_0 = arith.constant 0 : i32
    %c0_i32_1 = arith.constant 0 : i32
    return %c0_i32, %c0_i32_0 : i32, i32
  }
  func.func @transform_1(%arg0: i32) -> (i32, i32) {
    %c0_i32 = arith.constant 0 : i32
    %c0_i32_0 = arith.constant 0 : i32
    %c0_i32_1 = arith.constant 0 : i32
    return %c0_i32, %c0_i32_0 : i32, i32
  }
  func.func @transform_2(%arg0: i32) -> (i32, i32) {
    %c0_i32 = arith.constant 0 : i32
    %c0_i32_0 = arith.constant 0 : i32
    %c0_i32_1 = arith.constant 0 : i32
    return %c0_i32, %c0_i32_0 : i32, i32
  }
  func.func @transform_3(%arg0: i32) -> (i32, i32) {
    %c0_i32 = arith.constant 0 : i32
    %c0_i32_0 = arith.constant 0 : i32
    %c0_i32_1 = arith.constant 0 : i32
    return %c0_i32, %c0_i32_0 : i32, i32
  }
  func.func @transform_4(%arg0: i32) -> (i32, i32) {
    %c0_i32 = arith.constant 0 : i32
    %c0_i32_0 = arith.constant 0 : i32
    %c0_i32_1 = arith.constant 0 : i32
    return %c0_i32, %c0_i32_0 : i32, i32
  }
  func.func @transform_5(%arg0: i32) -> (i32, i32) {
    %c0_i32 = arith.constant 0 : i32
    %c0_i32_0 = arith.constant 0 : i32
    %c0_i32_1 = arith.constant 0 : i32
    return %c0_i32, %c0_i32_0 : i32, i32
  }
  func.func @transform_6(%arg0: i32) -> (i32, i32) {
    %c0_i32 = arith.constant 0 : i32
    %c0_i32_0 = arith.constant 0 : i32
    %c0_i32_1 = arith.constant 0 : i32
    return %c0_i32, %c0_i32_0 : i32, i32
  }
}

</mosaic_0001>

<bundles_post_ra>
// kernel: tpu_custom_call.1
= control target key start
LH: loop header
LB: loop body
LE: loop exit
PB: predicated region body
PF: predicated region fallthrough
CT: control target
= control target key end

     0   :  { %v1377_v3 = vmov 0.0|0.0   ;;  %v1378_v5 = vmov 0.0   ;;  %vm37_vm0 = vcmask 1040384   ;;  %vm33_vm1 = vcmask 7168   ;;  %s1576_s0 = inlined_call_operand.vmem [shape: f32[8,1], index: 0, kind: input, shape index: {}]   ;;  %s1577_s1 = inlined_call_operand.vmem [shape: f32[1,128], index: 1, kind: input, shape index: {}]   ;;  %s1578_s2 = inlined_call_operand.vmem [shape: f32[32,128], index: 2, kind: input, shape index: {}]   ;;  %s1579_s3 = inlined_call_operand.vmem [shape: f32[1,128], index: 3, kind: input, shape index: {}]   ;;  %s1580_s4 = inlined_call_operand.vmem [shape: f32[32,2], index: 4, kind: input, shape index: {}]   ;;  %s1581_s5 = inlined_call_operand.vmem [shape: f32[1,2], index: 5, kind: input, shape index: {}]   ;;  %s1582_s6 = inlined_call_operand.hbm [shape: f32[1,2], index: 6, kind: output, shape index: {}]  }
   0x1   :  { %v111_v0 = vld [vmem:[%s1578_s2] sm:$0xff]  ;;  %v112_v1 = vld [vmem:[%s1578_s2 + $0x8] sm:$0xff]  ;;  %1229 = vmatprep.subr.bf16.mxu1 %v1377_v3  ;;  %1125 = vmatprep.subr.mxu0 %v1378_v5  ;;  %v113_v7 = vld [vmem:[%s1578_s2 + $0x10] sm:$0xff]  ;;  %vm1379_vm2 = vmmov 0  }
   0x2   :  { %v25_v2 = vld [vmem:[%s1577_s1] sm:$0x1]  ;;  %v1428_v4 = vpack.c.bf16 %v112_v1, %v111_v0  ;;  %v114_v8 = vld [vmem:[%s1578_s2 + $0x18] sm:$0xff]  ;;  %1127 = vmatprep.mubr.msk.f32.mxu0 %vm1379_vm2, %v1378_v5 }
   0x3   :  { %v24_v6 = vld [vmem:[%s1576_s0] sm:$0xff]  ;;  %1126 = vmatpush3.msk.msra.mxu0 %vm37_vm0, %v25_v2 }
   0x4   :  { %11 = vsyncpa [#allocation3], 0  ;;  %1231 = vmatpush3.bf16.msra.mxu1 %v1428_v4  ;;  %1128 = vmatmul.mubr.msk.f32.vlgmr.msra.gmra.mrb[0].mxu0 %vm33_vm1, %v24_v6  ;;  %v1443_v9 = vpack.c.bf16 %v114_v8, %v113_v7  ;;  %v1059_v11 = vld [vmem:[%s1579_s3] ss:$0 sm:$0xff]  ;;  %s1380_s8 = smov 64   ;;  %s1381_s3 = smov 32  }
   0x5   :  { %1232 = vmatprep.subr.bf16.mxu1 %v1377_v3  ;;  %1138 = vmatprep.mubr.msk.f32.mxu1 %vm1379_vm2, %v1378_v5  ;;  %vm115_vm3 = vcmask 261120   ;;  %vm1043_vm4 = vcmask 8192  }
   0x6   :  { %1235 = vmatprep.subr.bf16.mxu0 %v1377_v3  ;;  %1149 = vmatprep.mubr.msk.f32.mxu0 %vm1379_vm2, %v1378_v5 }
   0x7   :  { %1237 = vmatpush3.bf16.msra.mxu0 %v1428_v4 }
   0x8   :  { %1234 = vmatpush3.bf16.msra.mxu1 %v1443_v9  ;;  %1238 = vmatprep.subr.bf16.mxu0 %v1377_v3 }
   0x9   :  { %1241 = vmatprep.subr.bf16.mxu1 %v1377_v3 }
   0xb   :  { %1139 = vmatmul.mubr.f32.vlgmr.msra.gmra.mrb[0].mxu1 %v1378_v5  ;;  %1240 = vmatpush3.bf16.msra.mxu0 %v1443_v9 }
   0xc   :  { %1243 = vmatpush3.bf16.msra.mxu1 %v1428_v4  ;;  %1160 = vmatprep.mubr.msk.f32.mxu1 %vm1379_vm2, %v1378_v5 }
   0xd   :  { %1244 = vmatprep.subr.bf16.mxu1 %v1377_v3  ;;  %1247 = vmatprep.subr.bf16.mxu0 %v1377_v3 }
  0x10   :  { %1246 = vmatpush3.bf16.msra.mxu1 %v1443_v9 }
  0x11   :  { %1253 = vmatprep.subr.bf16.mxu1 %v1377_v3 }
  0xd7   :  { %v107_v10 = vpop.f32.mrb[0].mxu0 }
  0xd8   :  { %v1129_v12 = vpop.f32.mrb[1].mxu0  ;;  %v1467_v13 = vadd.f32 %v1059_v11, %v107_v10 }
  0xde   :  { %v185_v14 = vpop.f32.mrb[0].mxu1 }
  0xdf   :  { %v189_v15 = vadd.f32 %v185_v14, %v1467_v13  ;;  %v1140_v16 = vpop.f32.mrb[1].mxu1 }
  0xe1   :  { %1289 = vtanh.f32 %v189_v15  ;;  %v1062_v18 = vmul.f32 -1.442695, %v189_v15 }
  0xe3   :  { %1291 = vpow2.f32 %v1062_v18 }
  0xeb   :  { %v1290_v17 = vpop.eup %1289 }
  0xec   :  { %199 = vrot.lane.b32.xlu0 %v1290_v17, %s1380_s8 }
  0xed   :  { %v1292_v19 = vpop.eup %1291 }
  0xee   :  { %v193_v20 = vadd.f32 1.0, %v1292_v19 }
  0xf0   :  { %1293 = vrcp.f32 %v193_v20 }
  0xfa   :  { %v1294_v21 = vpop.eup %1293 }
  0xfb   :  { %v197_v24 = vmul.f32 0.0, %v1294_v21 }
 0x15e   :  { %v200_v22 = vpop.permute.xlu0 %199 }
 0x15f   :  { %v202_v23 = vmul.f32 %v1294_v21, %v200_v22 }
 0x161   :  { %204 = vrot.lane.b32.xlu0 %v202_v23, %s1381_s3 }
 0x1d3   :  { %v205_v25 = vpop.permute.xlu0 %204 }
 0x1d4   :  { %v207_v26 = vadd.f32 %v205_v25, %v197_v24 }
 0x1d6   :  { %1295 = vtanh.f32 %v207_v26  ;;  %v301_v42 = vrot.slane %v207_v26, 7 }
 0x1e0   :  { %v1296_v27 = vpop.eup %1295 }
 0x1e1   :  { %210 = vrot.lane.b32.xlu1 %v1296_v27, %s1380_s8 }
 0x253   :  { %v211_v28 = vpop.permute.xlu1 %210 }
 0x254   :  { %v213_v29 = vmul.f32 %v1294_v21, %v211_v28 }
 0x256   :  { %215 = vrot.lane.b32.xlu1 %v213_v29, %s1381_s3 }
 0x2c8   :  { %v216_v30 = vpop.permute.xlu1 %215 }
 0x2c9   :  { %1150 = vmatmul.mubr.msk.f32.vlgmr.msra.gmra.mrb[2].mxu0 %vm115_vm3, %v216_v30 }
 0x2ca   :  { %1249 = vmatpush3.bf16.msra.mxu0 %v1428_v4  ;;  %1171 = vmatprep.mubr.msk.f32.mxu0 %vm1379_vm2, %v1378_v5 }
 0x2cb   :  { %1250 = vmatprep.subr.bf16.mxu0 %v1377_v3 }
 0x2ce   :  { %1252 = vmatpush3.bf16.msra.mxu0 %v1443_v9 }
 0x2cf   :  { %1259 = vmatprep.subr.bf16.mxu0 %v1377_v3 }
 0x39c   :  { %v285_v31 = vpop.f32.mrb[2].mxu0 }
 0x39d   :  { %v290_v32 = vrot.slane %v285_v31, 7  ;;  %v1151_v33 = vpop.f32.mrb[3].mxu0 }
 0x39f   :  { %v292_v34 = vadd.f32 %v290_v32, %v1467_v13 }
 0x3a1   :  { %1297 = vtanh.f32 %v292_v34  ;;  %v1064_v36 = vmul.f32 -1.442695, %v292_v34 }
 0x3a3   :  { %1299 = vpow2.f32 %v1064_v36 }
 0x3ab   :  { %v1298_v35 = vpop.eup %1297 }
 0x3ac   :  { %305 = vrot.lane.b32.xlu0 %v1298_v35, %s1380_s8 }
 0x3ad   :  { %v1300_v37 = vpop.eup %1299 }
 0x3ae   :  { %v296_v38 = vadd.f32 1.0, %v1300_v37 }
 0x3b0   :  { %1301 = vrcp.f32 %v296_v38 }
 0x3ba   :  { %v1302_v39 = vpop.eup %1301 }
 0x3bb   :  { %v303_v43 = vmul.f32 %v1302_v39, %v301_v42 }
 0x41e   :  { %v306_v40 = vpop.permute.xlu0 %305 }
 0x41f   :  { %v308_v41 = vmul.f32 %v1302_v39, %v306_v40 }
 0x421   :  { %310 = vrot.lane.b32.xlu1 %v308_v41, %s1381_s3 }
 0x493   :  { %v311_v44 = vpop.permute.xlu1 %310 }
 0x494   :  { %v313_v45 = vadd.f32 %v311_v44, %v303_v43 }
 0x496   :  { %1303 = vtanh.f32 %v313_v45  ;;  %v408_v62 = vrot.slane %v313_v45, 7 }
 0x4a0   :  { %v1304_v46 = vpop.eup %1303 }
 0x4a1   :  { %316 = vrot.lane.b32.xlu0 %v1304_v46, %s1380_s8 }
 0x513   :  { %v317_v47 = vpop.permute.xlu0 %316 }
 0x514   :  { %v319_v48 = vmul.f32 %v1302_v39, %v317_v47 }
 0x516   :  { %v321_v49 = vrot.slane %v319_v48, 1 }
 0x518   :  { %322 = vrot.lane.b32.xlu1 %v321_v49, %s1381_s3 }
 0x58a   :  { %v323_v50 = vpop.permute.xlu1 %322 }
 0x58b   :  { %1161 = vmatmul.mubr.msk.f32.vlgmr.msra.gmra.mrb[2].mxu1 %vm115_vm3, %v323_v50 }
 0x58c   :  { %1255 = vmatpush3.bf16.msra.mxu1 %v1428_v4  ;;  %1182 = vmatprep.mubr.msk.f32.mxu1 %vm1379_vm2, %v1378_v5 }
 0x58d   :  { %1256 = vmatprep.subr.bf16.mxu1 %v1377_v3 }
 0x590   :  { %1258 = vmatpush3.bf16.msra.mxu1 %v1443_v9 }
 0x591   :  { %1265 = vmatprep.subr.bf16.mxu1 %v1377_v3 }
 0x65e   :  { %v392_v51 = vpop.f32.mrb[2].mxu1 }
 0x65f   :  { %v397_v52 = vrot.slane %v392_v51, 6  ;;  %v1162_v53 = vpop.f32.mrb[3].mxu1 }
 0x661   :  { %v399_v54 = vadd.f32 %v397_v52, %v1467_v13 }
 0x663   :  { %1305 = vtanh.f32 %v399_v54  ;;  %v1066_v56 = vmul.f32 -1.442695, %v399_v54 }
 0x665   :  { %1307 = vpow2.f32 %v1066_v56 }
 0x66d   :  { %v1306_v55 = vpop.eup %1305 }
 0x66e   :  { %412 = vrot.lane.b32.xlu0 %v1306_v55, %s1380_s8 }
 0x66f   :  { %v1308_v57 = vpop.eup %1307 }
 0x670   :  { %v403_v58 = vadd.f32 1.0, %v1308_v57 }
 0x672   :  { %1309 = vrcp.f32 %v403_v58 }
 0x67c   :  { %v1310_v59 = vpop.eup %1309 }
 0x67d   :  { %v410_v63 = vmul.f32 %v1310_v59, %v408_v62 }
 0x6e0   :  { %v413_v60 = vpop.permute.xlu0 %412 }
 0x6e1   :  { %v415_v61 = vmul.f32 %v1310_v59, %v413_v60 }
 0x6e3   :  { %417 = vrot.lane.b32.xlu1 %v415_v61, %s1381_s3 }
 0x755   :  { %v418_v0 = vpop.permute.xlu1 %417 }
 0x756   :  { %v420_v1 = vadd.f32 %v418_v0, %v410_v63 }
 0x758   :  { %1311 = vtanh.f32 %v420_v1  ;;  %v515_v23 = vrot.slane %v420_v1, 7 }
 0x762   :  { %v1312_v2 = vpop.eup %1311 }
 0x763   :  { %423 = vrot.lane.b32.xlu0 %v1312_v2, %s1380_s8 }
 0x7d5   :  { %v424_v6 = vpop.permute.xlu0 %423 }
 0x7d6   :  { %v426_v7 = vmul.f32 %v1310_v59, %v424_v6 }
 0x7d8   :  { %v428_v8 = vrot.slane %v426_v7, 2 }
 0x7da   :  { %429 = vrot.lane.b32.xlu1 %v428_v8, %s1381_s3 }
 0x84c   :  { %v430_v10 = vpop.permute.xlu1 %429 }
 0x84d   :  { %1172 = vmatmul.mubr.msk.f32.vlgmr.msra.gmra.mrb[4].mxu0 %vm115_vm3, %v430_v10 }
 0x84e   :  { %1261 = vmatpush3.bf16.msra.mxu0 %v1428_v4  ;;  %1193 = vmatprep.mubr.msk.f32.mxu0 %vm1379_vm2, %v1378_v5 }
 0x84f   :  { %1262 = vmatprep.subr.bf16.mxu0 %v1377_v3 }
 0x852   :  { %1264 = vmatpush3.bf16.msra.mxu0 %v1443_v9 }
 0x853   :  { %1271 = vmatprep.subr.bf16.mxu0 %v1377_v3 }
 0x920   :  { %v499_v11 = vpop.f32.mrb[4].mxu0 }
 0x921   :  { %v504_v12 = vrot.slane %v499_v11, 5  ;;  %v1173_v14 = vpop.f32.mrb[5].mxu0 }
 0x923   :  { %v506_v15 = vadd.f32 %v504_v12, %v1467_v13 }
 0x925   :  { %1313 = vtanh.f32 %v506_v15  ;;  %v1068_v17 = vmul.f32 -1.442695, %v506_v15 }
 0x927   :  { %1315 = vpow2.f32 %v1068_v17 }
 0x92f   :  { %v1314_v16 = vpop.eup %1313 }
 0x930   :  { %519 = vrot.lane.b32.xlu0 %v1314_v16, %s1380_s8 }
 0x931   :  { %v1316_v18 = vpop.eup %1315 }
 0x932   :  { %v510_v19 = vadd.f32 1.0, %v1316_v18 }
 0x934   :  { %1317 = vrcp.f32 %v510_v19 }
 0x93e   :  { %v1318_v20 = vpop.eup %1317 }
 0x93f   :  { %v517_v24 = vmul.f32 %v1318_v20, %v515_v23 }
 0x9a2   :  { %v520_v21 = vpop.permute.xlu0 %519 }
 0x9a3   :  { %v522_v22 = vmul.f32 %v1318_v20, %v520_v21 }
 0x9a5   :  { %524 = vrot.lane.b32.xlu1 %v522_v22, %s1381_s3 }
 0xa17   :  { %v525_v25 = vpop.permute.xlu1 %524 }
 0xa18   :  { %v527_v26 = vadd.f32 %v525_v25, %v517_v24 }
 0xa1a   :  { %1319 = vtanh.f32 %v527_v26  ;;  %v622_v43 = vrot.slane %v527_v26, 7 }
 0xa24   :  { %v1320_v27 = vpop.eup %1319 }
 0xa25   :  { %530 = vrot.lane.b32.xlu0 %v1320_v27, %s1380_s8 }
 0xa97   :  { %v531_v28 = vpop.permute.xlu0 %530 }
 0xa98   :  { %v533_v29 = vmul.f32 %v1318_v20, %v531_v28 }
 0xa9a   :  { %v535_v30 = vrot.slane %v533_v29, 3 }
 0xa9c   :  { %536 = vrot.lane.b32.xlu1 %v535_v30, %s1381_s3 }
 0xb0e   :  { %v537_v31 = vpop.permute.xlu1 %536 }
 0xb0f   :  { %1183 = vmatmul.mubr.msk.f32.vlgmr.msra.gmra.mrb[4].mxu1 %vm115_vm3, %v537_v31 }
 0xb10   :  { %1267 = vmatpush3.bf16.msra.mxu1 %v1428_v4  ;;  %1204 = vmatprep.mubr.msk.f32.mxu1 %vm1379_vm2, %v1378_v5 }
 0xb11   :  { %1268 = vmatprep.subr.bf16.mxu1 %v1377_v3 }
 0xb14   :  { %1270 = vmatpush3.bf16.msra.mxu1 %v1443_v9 }
 0xb15   :  { %1277 = vmatprep.subr.bf16.mxu1 %v1377_v3 }
 0xbe2   :  { %v606_v32 = vpop.f32.mrb[4].mxu1 }
 0xbe3   :  { %v611_v33 = vrot.slane %v606_v32, 4  ;;  %v1184_v34 = vpop.f32.mrb[5].mxu1 }
 0xbe5   :  { %v613_v35 = vadd.f32 %v611_v33, %v1467_v13 }
 0xbe7   :  { %1321 = vtanh.f32 %v613_v35  ;;  %v1070_v37 = vmul.f32 -1.442695, %v613_v35 }
 0xbe9   :  { %1323 = vpow2.f32 %v1070_v37 }
 0xbf1   :  { %v1322_v36 = vpop.eup %1321 }
 0xbf2   :  { %626 = vrot.lane.b32.xlu0 %v1322_v36, %s1380_s8 }
 0xbf3   :  { %v1324_v38 = vpop.eup %1323 }
 0xbf4   :  { %v617_v39 = vadd.f32 1.0, %v1324_v38 }
 0xbf6   :  { %1325 = vrcp.f32 %v617_v39 }
 0xc00   :  { %v1326_v40 = vpop.eup %1325 }
 0xc01   :  { %v624_v44 = vmul.f32 %v1326_v40, %v622_v43 }
 0xc64   :  { %v627_v41 = vpop.permute.xlu0 %626 }
 0xc65   :  { %v629_v42 = vmul.f32 %v1326_v40, %v627_v41 }
 0xc67   :  { %631 = vrot.lane.b32.xlu1 %v629_v42, %s1381_s3 }
 0xcd9   :  { %v632_v45 = vpop.permute.xlu1 %631 }
 0xcda   :  { %v634_v46 = vadd.f32 %v632_v45, %v624_v44  ;;  %v963_v45 = vld [vmem:[%s1580_s4 + $0x8] sm:$0xff] }
 0xcdc   :  { %1327 = vtanh.f32 %v634_v46 }
 0xce6   :  { %v1328_v47 = vpop.eup %1327 }
 0xce7   :  { %637 = vrot.lane.b32.xlu0 %v1328_v47, %s1380_s8 }
 0xd59   :  { %v638_v48 = vpop.permute.xlu0 %637 }
 0xd5a   :  { %v640_v49 = vmul.f32 %v1326_v40, %v638_v48  ;;  %v965_v48 = vld [vmem:[%s1580_s4 + $0x18] sm:$0xff] }
 0xd5c   :  { %v642_v50 = vrot.slane %v640_v49, 4 }
 0xd5e   :  { %643 = vrot.lane.b32.xlu1 %v642_v50, %s1381_s3 }
 0xdd0   :  { %v644_v51 = vpop.permute.xlu1 %643 }
 0xdd1   :  { %1194 = vmatmul.mubr.msk.f32.vlgmr.msra.gmra.mrb[6].mxu0 %vm115_vm3, %v644_v51 }
 0xdd2   :  { %1273 = vmatpush3.bf16.msra.mxu0 %v1428_v4  ;;  %1215 = vmatprep.mubr.msk.f32.mxu0 %vm1379_vm2, %v1378_v5 }
 0xdd3   :  { %1274 = vmatprep.subr.bf16.mxu0 %v1377_v3 }
 0xdd6   :  { %1276 = vmatpush3.bf16.msra.mxu0 %v1443_v9  ;;  %v729_v9 = vrot.slane %v634_v46, 7  ;;  %v964_v46 = vld [vmem:[%s1580_s4 + $0x10] sm:$0xff] }
 0xdd7   :  { %v1281_v49 = vpack.c.bf16 %v965_v48, %v964_v46 }
 0xea4   :  { %v713_v52 = vpop.f32.mrb[6].mxu0 }
 0xea5   :  { %v718_v53 = vrot.slane %v713_v52, 3  ;;  %v1195_v54 = vpop.f32.mrb[7].mxu0 }
 0xea7   :  { %v720_v55 = vadd.f32 %v718_v53, %v1467_v13 }
 0xea9   :  { %1329 = vtanh.f32 %v720_v55  ;;  %v1072_v57 = vmul.f32 -1.442695, %v720_v55  ;;  %v966_v55 = vld [vmem:[%s1581_s5] sm:$0x1] }
 0xeab   :  { %1331 = vpow2.f32 %v1072_v57 }
 0xeb3   :  { %v1330_v56 = vpop.eup %1329 }
 0xeb4   :  { %733 = vrot.lane.b32.xlu0 %v1330_v56, %s1380_s8 }
 0xeb5   :  { %v1332_v58 = vpop.eup %1331 }
 0xeb6   :  { %v724_v4 = vadd.f32 1.0, %v1332_v58 }
 0xeb8   :  { %1333 = vrcp.f32 %v724_v4 }
 0xec2   :  { %v1334_v59 = vpop.eup %1333 }
 0xec3   :  { %v731_v62 = vmul.f32 %v1334_v59, %v729_v9 }
 0xf26   :  { %v734_v60 = vpop.permute.xlu0 %733 }
 0xf27   :  { %v736_v61 = vmul.f32 %v1334_v59, %v734_v60 }
 0xf29   :  { %738 = vrot.lane.b32.xlu1 %v736_v61, %s1381_s3 }
 0xf9b   :  { %v739_v63 = vpop.permute.xlu1 %738 }
 0xf9c   :  { %v741_v0 = vadd.f32 %v739_v63, %v731_v62 }
 0xf9e   :  { %1335 = vtanh.f32 %v741_v0 }
 0xfa8   :  { %v1336_v1 = vpop.eup %1335 }
 0xfa9   :  { %744 = vrot.lane.b32.xlu0 %v1336_v1, %s1380_s8 }
0x101b   :  { %v745_v2 = vpop.permute.xlu0 %744 }
0x101c   :  { %v747_v6 = vmul.f32 %v1334_v59, %v745_v2 }
0x101e   :  { %v749_v7 = vrot.slane %v747_v6, 5 }
0x1020   :  { %750 = vrot.lane.b32.xlu1 %v749_v7, %s1381_s3 }
0x1092   :  { %v751_v8 = vpop.permute.xlu1 %750 }
0x1093   :  { %1205 = vmatmul.mubr.msk.f32.vlgmr.msra.gmra.mrb[6].mxu1 %vm115_vm3, %v751_v8 }
0x1094   :  { %1226 = vmatprep.mubr.msk.f32.mxu1 %vm1379_vm2, %v1378_v5  ;;  %v836_v5 = vrot.slane %v741_v0, 7 }
0x1166   :  { %v820_v10 = vpop.f32.mrb[6].mxu1 }
0x1167   :  { %v825_v11 = vrot.slane %v820_v10, 2  ;;  %v1206_v12 = vpop.f32.mrb[7].mxu1 }
0x1169   :  { %v827_v14 = vadd.f32 %v825_v11, %v1467_v13 }
0x116b   :  { %1337 = vtanh.f32 %v827_v14  ;;  %v1074_v16 = vmul.f32 -1.442695, %v827_v14 }
0x116d   :  { %1339 = vpow2.f32 %v1074_v16 }
0x1175   :  { %v1338_v15 = vpop.eup %1337 }
0x1176   :  { %840 = vrot.lane.b32.xlu0 %v1338_v15, %s1380_s8 }
0x1177   :  { %v1340_v17 = vpop.eup %1339 }
0x1178   :  { %v831_v18 = vadd.f32 1.0, %v1340_v17 }
0x117a   :  { %1341 = vrcp.f32 %v831_v18 }
0x1184   :  { %v1342_v19 = vpop.eup %1341 }
0x1185   :  { %v838_v22 = vmul.f32 %v1342_v19, %v836_v5 }
0x11e8   :  { %v841_v20 = vpop.permute.xlu0 %840 }
0x11e9   :  { %v843_v21 = vmul.f32 %v1342_v19, %v841_v20 }
0x11eb   :  { %845 = vrot.lane.b32.xlu1 %v843_v21, %s1381_s3 }
0x125d   :  { %v846_v23 = vpop.permute.xlu1 %845 }
0x125e   :  { %v848_v24 = vadd.f32 %v846_v23, %v838_v22 }
0x1260   :  { %1343 = vtanh.f32 %v848_v24  ;;  %v943_v41 = vrot.slane %v848_v24, 7 }
0x126a   :  { %v1344_v25 = vpop.eup %1343 }
0x126b   :  { %851 = vrot.lane.b32.xlu0 %v1344_v25, %s1380_s8 }
0x12dd   :  { %v852_v26 = vpop.permute.xlu0 %851 }
0x12de   :  { %v854_v27 = vmul.f32 %v1342_v19, %v852_v26 }
0x12e0   :  { %v856_v28 = vrot.slane %v854_v27, 6 }
0x12e2   :  { %857 = vrot.lane.b32.xlu1 %v856_v28, %s1381_s3 }
0x1354   :  { %v858_v29 = vpop.permute.xlu1 %857 }
0x1355   :  { %1216 = vmatmul.mubr.msk.f32.vlgmr.msra.gmra.mrb[8].mxu0 %vm115_vm3, %v858_v29 }
0x1428   :  { %v927_v30 = vpop.f32.mrb[8].mxu0 }
0x1429   :  { %v932_v31 = vrot.slane %v927_v30, 1  ;;  %v1217_v32 = vpop.f32.mrb[9].mxu0 }
0x142b   :  { %v934_v33 = vadd.f32 %v932_v31, %v1467_v13  ;;  %v962_v13 = vld [vmem:[%s1580_s4] sm:$0xff]  ;;  %s1382_s4 = smov [#allocation2]  }
0x142c   :  { %v1278_v47 = vpack.c.bf16 %v963_v45, %v962_v13  ;;  %s1051_s19 = sshll.u32 %s1382_s4, 4  ;;  %s1052_s19 = int_to_ptr.vmem [resolvable:$true] %s1051_s19 }
0x142d   :  { %1345 = vtanh.f32 %v934_v33  ;;  %v1076_v35 = vmul.f32 -1.442695, %v934_v33  ;;  %s1353_s20 = scalar_lea.vmem %s1052_s19, 16  ;;  %s1357_s21 = scalar_lea.vmem %s1052_s19, 32 }
0x142e   :  { %1279 = vmatpush3.bf16.msra.mxu1 %v1278_v47  ;;  %p1354_p0 = scmp.ne.s32.totalorder %s1052_s19, %s1353_s20  ;;  %p1358_p1 = scmp.lt.s32.totalorder %s1052_s19, %s1052_s19 }
0x142f   :  { %1347 = vpow2.f32 %v1076_v35  ;;  %1280 = vmatprep.subr.bf16.mxu1 %v1377_v3  ;;  %p1359_p2 = scmp.lt.s32.totalorder %s1357_s21, %s1353_s20 }
0x1431   :  { %p1360_p3 = por %p1359_p2, %p1358_p1 }
0x1432   :  { %1282 = vmatpush3.bf16.msra.mxu1 %v1281_v49 }
0x1433   :  { %p1361_p4 = pnand %p1360_p3, %p1354_p0 }
0x1437   :  { %v1346_v34 = vpop.eup %1345 }
0x1438   :  { %947 = vrot.lane.b32.xlu0 %v1346_v34, %s1380_s8 }
0x1439   :  { %v1348_v36 = vpop.eup %1347 }
0x143a   :  { %v938_v37 = vadd.f32 1.0, %v1348_v36 }
0x143c   :  { %1349 = vrcp.f32 %v938_v37 }
0x1446   :  { %v1350_v38 = vpop.eup %1349 }
0x1447   :  { %v945_v42 = vmul.f32 %v1350_v38, %v943_v41 }
0x14aa   :  { %v948_v39 = vpop.permute.xlu0 %947 }
0x14ab   :  { %v950_v40 = vmul.f32 %v1350_v38, %v948_v39 }
0x14ad   :  { %952 = vrot.lane.b32.xlu1 %v950_v40, %s1381_s3 }
0x151f   :  { %v953_v43 = vpop.permute.xlu1 %952 }
0x1520   :  { %v955_v44 = vadd.f32 %v953_v43, %v945_v42 }
0x1522   :  { %1351 = vtanh.f32 %v955_v44 }
0x152c   :  { %v1352_v50 = vpop.eup %1351 }
0x152d   :  { %958 = vrot.lane.b32.xlu0 %v1352_v50, %s1380_s8 }
0x159f   :  { %v959_v51 = vpop.permute.xlu0 %958 }
0x15a0   :  { %v961_v52 = vmul.f32 %v1350_v38, %v959_v51 }
0x15a2   :  { %v968_v53 = vrot.slane %v961_v52, 7 }
0x15a4   :  { %969 = vrot.lane.b32.xlu1 %v968_v53, %s1381_s3 }
0x1616   :  { %v970_v54 = vpop.permute.xlu1 %969 }
0x1617   :  { %1227 = vmatmul.mubr.msk.f32.vlgmr.msra.gmra.mrb[8].mxu1 %vm115_vm3, %v970_v54 }
0x16ea   :  { %v1039_v56 = vpop.f32.mrb[8].mxu1 }
0x16eb   :  { %v1040_v3 = vadd.f32 %v1039_v56, %v966_v55  ;;  %v1228_v57 = vpop.f32.mrb[9].mxu1 }
0x16ed   :  { %1044 = vst.msk [vmem:[#allocation2] sm:$0x1] %vm1043_vm4, %v1040_v3 }
0x16ee   :  { %1364 = shalt.err (!%p1361_p4)
}
0x16ef   :  { %s1365_s5 = scalar_lea.hbm %s1582_s6, 16 }
0x16f0   :  { %p1366_p5 = scmp.ne.s32.totalorder %s1582_s6, %s1365_s5  ;;  %p1369_p6 = scmp.lt.u32.totalorder %s1365_s5, %s1582_s6 }
0x16f2   :  { %p1371_p7 = pnand %p1369_p6, %p1366_p5 }
0x16f4   :  { %1374 = shalt.err (!%p1371_p7)
}
0x16f5   :  { %1054 = dma.vmem_to_hbm [thread:$0]  %s1052_s19, 16, %s1582_s6, [#allocation3]  }
0x16f6   :  { %1375 = dma.done.wait [#allocation3], 16  }
0x16f7   :  { %1376 = vsyncadd [#allocation3], 4294967280 }
0x16f8   :  { %1058 = vsyncpa [#allocation3], 1 }

</bundles_post_ra>
